<compile_context>
chip_gen: v7x
topology: tpu7x:2x2x1
jax: 0.10.0
libtpu: 0.0.40
codegen_flags: <defaults>
</compile_context>

<pallas_src>
import jax
import jax.numpy as jnp
from jax.experimental import pallas as pl
from jax.experimental.pallas import tpu as pltpu

_MiB = 1024 * 1024


def _round_up(n, m):
    return (n + m - 1) // m * m


def _tpu_hw_info():
    """(physical per-core VMEM bytes, TensorCores per chip) with safe fallbacks."""
    vmem = 128 * _MiB
    try:
        vmem = int(pltpu.get_tpu_info().vmem_capacity_bytes)
    except Exception:  # API unavailable -> conservative v5e/v6e default
        pass
    kind = ""
    try:
        kind = jax.devices()[0].device_kind.lower()
    except Exception:
        pass
    two_tc = ("v7" in kind) or (vmem <= 64 * _MiB)
    return vmem, (2 if two_tc else 1)


def pointwise_feed_forward(x, w1, b1, w2, b2, *, tm=512, matmul_dtype=None):
    """x: (B, L, H).  w1, w2: (H, H) torch convention (out_ch, in_ch).
    b1, b2: (H,).  Returns (B, L, H) = x + Lin2(ReLU(Lin1(x)))."""
    B, L, H = x.shape
    M = B * L
    x2d = x.reshape(M, H)                      # free reshape (row-major view)

    phys_vmem, num_tc = _tpu_hw_info()
    vmem_cap = phys_vmem * 3 // 4              # ~48 MiB v7x, ~96 MiB v5e/v6e

    # ---- matmul operand dtype ------------------------------------------------
    if matmul_dtype is None:
        if x.dtype == jnp.bfloat16:
            matmul_dtype = jnp.bfloat16
        elif 2 * H * H * 4 > vmem_cap // 2:
            # f32 resident weights would dominate VMEM -> bf16 MXU fast path
            # (f32 accumulation; bias/ReLU/residual stay f32).
            matmul_dtype = jnp.bfloat16
        else:
            matmul_dtype = x.dtype
    matmul_dtype = jnp.dtype(matmul_dtype)

    x_item = jnp.dtype(x.dtype).itemsize
    w_item = matmul_dtype.itemsize
    Hl = _round_up(H, 128)                     # lane-padded width inside VMEM only

    use_buffered = hasattr(pl, "Buffered")
    weight_bufs = 1 if use_buffered else 2     # single-buffered resident weights

    # ---- row tile size -------------------------------------------------------
    tm_eff = _round_up(min(max(int(tm), 16), max(M, 16)), 16)
    if num_tc >= 2:
        # keep >= 4 grid steps when possible so both TensorCores get tiles
        tm_eff = min(tm_eff, max(16, _round_up(pl.cdiv(M, 4), 16)))

    def _vmem_est(t):
        chunk_rows = min(t, 256) if H >= 512 else t
        weights = 2 * Hl * Hl * w_item * weight_bufs        # resident W1^T, W2^T
        biases = 2 * 2 * 8 * Hl * 4                         # (1,H) pads to (8,Hl)
        io = 2 * 2 * t * Hl * x_item                        # double-buffered in/out tiles
        inter = 2 * chunk_rows * Hl * 4                     # live f32 intermediates h, y
        return weights + biases + io + inter

    while tm_eff > 16 and _vmem_est(tm_eff) > vmem_cap:
        tm_eff = max(16, _round_up(tm_eff // 2, 16))
    vmem_limit = int(min(vmem_cap, max(32 * _MiB, _vmem_est(tm_eff) * 5 // 4)))

    grid_steps = int(pl.cdiv(M, tm_eff))

    # ---- in-kernel row sub-chunking (compute-bound regime only) --------------
    chunk = tm_eff
    if H >= 512 and tm_eff > 256:
        for c in (256, 128, 64, 32, 16):
            if tm_eff % c == 0:
                chunk = c
                break
    n_chunks = tm_eff // chunk

    # ---- kernel ---------------------------------------------------------------
    def _ffn_kernel(x_ref, w1_ref, b1_ref, w2_ref, b2_ref, o_ref):
        w1v = w1_ref[...]          # (H, H) pre-transposed, resident
        w2v = w2_ref[...]
        b1v = b1_ref[...]          # (1, H) f32
        b2v = b2_ref[...]

        def do_chunk(c, carry):
            r0 = pl.multiple_of(c * chunk, chunk)
            xc = x_ref[pl.ds(r0, chunk), :]
            h = jnp.dot(xc.astype(matmul_dtype), w1v,
                        preferred_element_type=jnp.float32)
            h = jnp.maximum(h + b1v, 0.0)                    # bias + ReLU, f32 VPU
            y = jnp.dot(h.astype(matmul_dtype), w2v,
                        preferred_element_type=jnp.float32)
            y = y + b2v + xc.astype(jnp.float32)             # bias + residual, f32
            o_ref[pl.ds(r0, chunk), :] = y.astype(o_ref.dtype)
            return carry

        if n_chunks == 1:
            do_chunk(0, 0)
        else:
            jax.lax.fori_loop(0, n_chunks, do_chunk, 0, unroll=True)

    # ---- host-side packing (weights/biases only; tiny & one-time) ------------
    w1_t = w1.T.astype(matmul_dtype)           # (in, out) so h = x @ w1_t + b1
    w2_t = w2.T.astype(matmul_dtype)
    b1_p = b1.astype(jnp.float32).reshape(1, H)
    b2_p = b2.astype(jnp.float32).reshape(1, H)

    # ---- advisory cost estimate (memory-bound reality: no pad/slice copies) --
    cost = pl.CostEstimate(
        flops=int(4 * M * H * H),
        transcendentals=0,
        bytes_accessed=int(2 * M * H * x_item              # read x + write out
                           + 2 * H * H * w_item            # resident weights (once)
                           + grid_steps * 2 * H * 4),      # bias reads per step
    )

    def _run(single_buffer_weights):
        if single_buffer_weights:
            def w_spec():
                return pl.BlockSpec((H, H), lambda i: (0, 0),
                                    pipeline_mode=pl.Buffered(1))
        else:
            def w_spec():
                return pl.BlockSpec((H, H), lambda i: (0, 0))
        in_specs = [
            pl.BlockSpec((tm_eff, H), lambda i: (i, 0)),    # x row tile
            w_spec(),                                       # W1^T (resident)
            pl.BlockSpec((1, H), lambda i: (0, 0)),         # b1
            w_spec(),                                       # W2^T (resident)
            pl.BlockSpec((1, H), lambda i: (0, 0)),         # b2
        ]
        out_specs = pl.BlockSpec((tm_eff, H), lambda i: (i, 0))
        return pl.pallas_call(
            _ffn_kernel,
            out_shape=jax.ShapeDtypeStruct((M, H), x.dtype),
            grid_spec=pltpu.PrefetchScalarGridSpec(
                num_scalar_prefetch=0,
                grid=(grid_steps,),
                in_specs=in_specs,
                out_specs=out_specs,
            ),
            compiler_params=pltpu.CompilerParams(
                dimension_semantics=("parallel",),
                vmem_limit_bytes=vmem_limit),
            cost_estimate=cost,
        )(x2d, w1_t, b1_p, w2_t, b2_p)

    if use_buffered:
        try:
            out2d = _run(True)
        except (TypeError, NotImplementedError, pltpu.LoweringException):
            # Only pipeline_mode / Buffered(1) incompatibilities fall back;
            # genuine shape or VMEM errors propagate.
            out2d = _run(False)
    else:
        out2d = _run(False)

    return out2d.reshape(B, L, H)


def _reference(x, w1, b1, w2, b2):
    # Pure-JAX reference matching the PyTorch module in eval mode (f32).
    xf = x.astype(jnp.float32)
    h = jnp.einsum("blh,oh->blo", xf, w1.astype(jnp.float32)) + b1.astype(jnp.float32)
    h = jnp.maximum(h, 0.0)
    y = jnp.einsum("blh,oh->blo", h, w2.astype(jnp.float32)) + b2.astype(jnp.float32)
    return (y + xf).astype(x.dtype)


if __name__ == "__main__":
    B, L, H = 2, 8, 32          # batch, seq len, hidden_units
    key = jax.random.PRNGKey(0)
    kx, k1, k2, k3, k4 = jax.random.split(key, 5)

    x = jax.random.normal(kx, (B, L, H), dtype=jnp.float32)

    # Deterministic param init (torch Conv1d default: U(-s, s), s = 1/sqrt(fan_in))
    s = 1.0 / (H ** 0.5)
    w1 = jax.random.uniform(k1, (H, H), jnp.float32, -s, s)   # (out_ch, in_ch)
    b1 = jax.random.uniform(k2, (H,), jnp.float32, -s, s)
    w2 = jax.random.uniform(k3, (H, H), jnp.float32, -s, s)
    b2 = jax.random.uniform(k4, (H,), jnp.float32, -s, s)

    # 1) f32 matmul path (tight tolerance vs reference)
    out = jax.block_until_ready(pointwise_feed_forward(x, w1, b1, w2, b2))
    ref = _reference(x, w1, b1, w2, b2)
    assert out.shape == (B, L, H)
    assert jnp.allclose(out, ref, atol=1e-5, rtol=1e-5), "f32 mismatch vs reference"

    # 2) ragged M (exercises pl.cdiv grid + masked boundary tile, no host pad/slice)
    B2, L2 = 3, 37
    x2 = jax.random.normal(kx, (B2, L2, H), dtype=jnp.float32)
    out2 = jax.block_until_ready(pointwise_feed_forward(x2, w1, b1, w2, b2, tm=64))
    ref2 = _reference(x2, w1, b1, w2, b2)
    assert jnp.allclose(out2, ref2, atol=1e-5, rtol=1e-5), "ragged-grid mismatch"

    # 3) bf16 matmul operands with f32 accumulation (v6e/v7x MXU fast path)
    out_bf = jax.block_until_ready(
        pointwise_feed_forward(x, w1, b1, w2, b2, matmul_dtype=jnp.bfloat16))
    assert jnp.allclose(out_bf, ref, atol=1e-1, rtol=1e-1), "bf16 path mismatch"

    print("KERNEL_OK")
</pallas_src>

<mosaic_0001>
module attributes {stable_mosaic.version = 11 : i64} {
  func.func @_ffn_kernel(%arg0: i32, %arg1: memref<16x32xf32, #tpu.memory_space<vmem>>, %arg2: memref<32x32xf32, #tpu.memory_space<vmem>>, %arg3: memref<1x32xf32, #tpu.memory_space<vmem>>, %arg4: memref<32x32xf32, #tpu.memory_space<vmem>>, %arg5: memref<1x32xf32, #tpu.memory_space<vmem>>, %arg6: memref<16x32xf32, #tpu.memory_space<vmem>>) attributes {dimension_semantics = [#tpu.dimension_semantics<parallel>], iteration_bounds = array<i64: 1>, scalar_prefetch = 0 : i64, scratch_operands = 0 : i64, tpu.core_type = #tpu.core_type<tc>, window_params = [{transform_indices = @transform_0, window_bounds = array<i64: 16, 32>}, {pipeline_mode = #tpu.pipeline_mode<synchronous>, transform_indices = @transform_1, window_bounds = array<i64: 32, 32>}, {pipeline_mode = #tpu.pipeline_mode<synchronous>, transform_indices = @transform_2, window_bounds = array<i64: 1, 32>}, {pipeline_mode = #tpu.pipeline_mode<synchronous>, transform_indices = @transform_3, window_bounds = array<i64: 32, 32>}, {pipeline_mode = #tpu.pipeline_mode<synchronous>, transform_indices = @transform_4, window_bounds = array<i64: 1, 32>}, {transform_indices = @transform_5, window_bounds = array<i64: 16, 32>}]} {
    %c0 = arith.constant 0 : index
    %c0_0 = arith.constant 0 : index
    %0 = vector.load %arg2[%c0, %c0_0] : memref<32x32xf32, #tpu.memory_space<vmem>>, vector<32x32xf32>
    %c0_1 = arith.constant 0 : index
    %c0_2 = arith.constant 0 : index
    %1 = vector.load %arg4[%c0_1, %c0_2] : memref<32x32xf32, #tpu.memory_space<vmem>>, vector<32x32xf32>
    %c0_3 = arith.constant 0 : index
    %c0_4 = arith.constant 0 : index
    %2 = vector.load %arg3[%c0_3, %c0_4] : memref<1x32xf32, #tpu.memory_space<vmem>>, vector<1x32xf32>
    %c0_5 = arith.constant 0 : index
    %c0_6 = arith.constant 0 : index
    %3 = vector.load %arg5[%c0_5, %c0_6] : memref<1x32xf32, #tpu.memory_space<vmem>>, vector<1x32xf32>
    %c0_i32 = arith.constant 0 : i32
    %4 = tpu.assume_multiple %c0_i32, 16 : i32
    %5 = arith.index_cast %4 : i32 to index
    %c0_7 = arith.constant 0 : index
    %6 = vector.load %arg1[%5, %c0_7] : memref<16x32xf32, #tpu.memory_space<vmem>>, vector<16x32xf32>
    %cst = arith.constant dense<0.000000e+00> : vector<16x32xf32>
    %7 = tpu.matmul %6, %0, %cst {dimension_numbers = #tpu.dot_dimension_numbers<[1], [0], [0], [1], [0, 0, 1, 1], [], []>} : vector<16x32xf32>, vector<32x32xf32>, vector<16x32xf32> -> vector<16x32xf32>
    %8 = vector.broadcast %2 : vector<1x32xf32> to vector<16x32xf32>
    %9 = arith.addf %7, %8 : vector<16x32xf32>
    %cst_8 = arith.constant 0.000000e+00 : f32
    %10 = vector.broadcast %cst_8 : f32 to vector<16x32xf32>
    %11 = arith.maximumf %9, %10 : vector<16x32xf32>
    %cst_9 = arith.constant dense<0.000000e+00> : vector<16x32xf32>
    %12 = tpu.matmul %11, %1, %cst_9 {dimension_numbers = #tpu.dot_dimension_numbers<[1], [0], [0], [1], [0, 0, 1, 1], [], []>} : vector<16x32xf32>, vector<32x32xf32>, vector<16x32xf32> -> vector<16x32xf32>
    %13 = vector.broadcast %3 : vector<1x32xf32> to vector<16x32xf32>
    %14 = arith.addf %12, %13 : vector<16x32xf32>
    %15 = arith.addf %14, %6 : vector<16x32xf32>
    %16 = arith.index_cast %4 : i32 to index
    %c0_10 = arith.constant 0 : index
    %17 = vector.load %arg6[%16, %c0_10] : memref<16x32xf32, #tpu.memory_space<vmem>>, vector<16x32xf32>
    tpu.vector_store %arg6[%16, %c0_10], %15 {strides = array<i32>} : memref<16x32xf32, #tpu.memory_space<vmem>>, vector<16x32xf32>,
    return
  }
  func.func @transform_0(%arg0: i32) -> (i32, i32) {
    %c0_i32 = arith.constant 0 : i32
    %c0_i32_0 = arith.constant 0 : i32
    return %arg0, %c0_i32 : i32, i32
  }
  func.func @transform_1(%arg0: i32) -> (i32, i32) {
    %c0_i32 = arith.constant 0 : i32
    %c0_i32_0 = arith.constant 0 : i32
    %c0_i32_1 = arith.constant 0 : i32
    return %c0_i32, %c0_i32_0 : i32, i32
  }
  func.func @transform_2(%arg0: i32) -> (i32, i32) {
    %c0_i32 = arith.constant 0 : i32
    %c0_i32_0 = arith.constant 0 : i32
    %c0_i32_1 = arith.constant 0 : i32
    return %c0_i32, %c0_i32_0 : i32, i32
  }
  func.func @transform_3(%arg0: i32) -> (i32, i32) {
    %c0_i32 = arith.constant 0 : i32
    %c0_i32_0 = arith.constant 0 : i32
    %c0_i32_1 = arith.constant 0 : i32
    return %c0_i32, %c0_i32_0 : i32, i32
  }
  func.func @transform_4(%arg0: i32) -> (i32, i32) {
    %c0_i32 = arith.constant 0 : i32
    %c0_i32_0 = arith.constant 0 : i32
    %c0_i32_1 = arith.constant 0 : i32
    return %c0_i32, %c0_i32_0 : i32, i32
  }
  func.func @transform_5(%arg0: i32) -> (i32, i32) {
    %c0_i32 = arith.constant 0 : i32
    %c0_i32_0 = arith.constant 0 : i32
    return %arg0, %c0_i32 : i32, i32
  }
}

</mosaic_0001>

<bundles_post_ra>
// kernel: tpu_custom_call.1
= control target key start
LH: loop header
LB: loop body
LE: loop exit
PB: predicated region body
PF: predicated region fallthrough
CT: control target
= control target key end

     0   :  { %10 = vsyncpa [#allocation3], 0  ;;  %s544_s0 = inlined_call_operand.hbm [shape: f32[16,32], index: 0, kind: input, shape index: {}]   ;;  %s545_s1 = inlined_call_operand.hbm [shape: f32[32,32], index: 1, kind: input, shape index: {}]   ;;  %s546_s2 = inlined_call_operand.vmem [shape: f32[1,32], index: 2, kind: input, shape index: {}]   ;;  %s547_s3 = inlined_call_operand.hbm [shape: f32[32,32], index: 3, kind: input, shape index: {}]   ;;  %s548_s4 = inlined_call_operand.vmem [shape: f32[1,32], index: 4, kind: input, shape index: {}]   ;;  %s549_s5 = inlined_call_operand.hbm [shape: f32[16,32], index: 5, kind: output, shape index: {}]  }
   0x1   :  { %11 = vsyncpa [#allocation6], 0 }
   0x2   :  { %12 = vsyncpa [#allocation4], 0  ;;  %s429_s18 = smov [#allocation5]   ;;  %s430_s20 = smov [#allocation2]  }
   0x3   :  { %s30_s19 = sshll.u32 %s429_s18, 4  ;;  %s18_s21 = sshll.u32 %s430_s20, 4  ;;  %s31_s19 = int_to_ptr.vmem [resolvable:$true] %s30_s19  ;;  %s465_s21 = int_to_ptr.vmem [resolvable:$true] %s18_s21 }
   0x4   :  { %s335_s24 = scalar_lea.hbm %s545_s1, 512 }
   0x5   :  { %p336_p0 = scmp.ne.s32.totalorder %s545_s1, %s335_s24  ;;  %p339_p1 = scmp.lt.u32.totalorder %s335_s24, %s545_s1 }
   0x7   :  { %p341_p2 = pnand %p339_p1, %p336_p0 }
   0x9   :  { %344 = shalt.err (!%p341_p2)
}
   0xa   :  { %s345_s29 = scalar_lea.vmem %s31_s19, 512  ;;  %p350_p4 = scmp.lt.s32.totalorder %s31_s19, %s31_s19 }
   0xb   :  { %p346_p3 = scmp.ne.s32.totalorder %s31_s19, %s345_s29  ;;  %p351_p5 = scmp.lt.s32.totalorder %s345_s29, %s345_s29 }
   0xd   :  { %p352_p6 = por %p351_p5, %p350_p4 }
   0xf   :  { %p353_p7 = pnand %p352_p6, %p346_p3 }
  0x11   :  { %356 = shalt.err (!%p353_p7)
}
  0x12   :  { %s431_s30 = smov 128   ;;  %s432_s6 = smov 8  }
  0x13   :  { %36 = dma.hbm_to_vmem [thread:$0]  %s545_s1, 512, %s31_s19, [#allocation6], %s431_s30, %s431_s30, %s432_s6  }
  0x14   :  { %s357_s11 = scalar_lea.hbm %s544_s0, 256 }
  0x15   :  { %p358_p8 = scmp.ne.s32.totalorder %s544_s0, %s357_s11  ;;  %p361_p9 = scmp.lt.u32.totalorder %s357_s11, %s544_s0 }
  0x17   :  { %p363_p10 = pnand %p361_p9, %p358_p8 }
  0x19   :  { %366 = shalt.err (!%p363_p10)
}
  0x1a   :  { %s367_s16 = scalar_lea.vmem %s465_s21, 256  ;;  %p372_p12 = scmp.lt.s32.totalorder %s465_s21, %s465_s21 }
  0x1b   :  { %p368_p11 = scmp.ne.s32.totalorder %s465_s21, %s367_s16  ;;  %p373_p13 = scmp.lt.s32.totalorder %s367_s16, %s367_s16 }
  0x1d   :  { %p374_p0 = por %p373_p13, %p372_p12 }
  0x1f   :  { %p375_p1 = pnand %p374_p0, %p368_p11 }
  0x21   :  { %378 = shalt.err (!%p375_p1)
}
  0x22   :  { %24 = dma.hbm_to_vmem [thread:$0]  %s544_s0, 256, %s465_s21, [#allocation3], %s431_s30, %s431_s30, %s432_s6  }
  0x23   :  { %s433_s18 = smov [#allocation7]   ;;  %s379_s23 = scalar_lea.hbm %s547_s3, 512 }
  0x24   :  { %s44_s19 = sshll.u32 %s433_s18, 4  ;;  %p380_p2 = scmp.ne.s32.totalorder %s547_s3, %s379_s23  ;;  %s45_s19 = int_to_ptr.vmem [resolvable:$true] %s44_s19 }
  0x25   :  { %p383_p3 = scmp.lt.u32.totalorder %s379_s23, %s547_s3 }
  0x27   :  { %p385_p4 = pnand %p383_p3, %p380_p2 }
  0x29   :  { %388 = shalt.err (!%p385_p4)
}
  0x2a   :  { %s389_s28 = scalar_lea.vmem %s45_s19, 512  ;;  %p394_p6 = scmp.lt.s32.totalorder %s45_s19, %s45_s19 }
  0x2b   :  { %p390_p5 = scmp.ne.s32.totalorder %s45_s19, %s389_s28  ;;  %p395_p7 = scmp.lt.s32.totalorder %s389_s28, %s389_s28 }
  0x2d   :  { %p396_p8 = por %p395_p7, %p394_p6 }
  0x2f   :  { %p397_p9 = pnand %p396_p8, %p390_p5 }
  0x31   :  { %400 = shalt.err (!%p397_p9)
}
  0x32   :  { %50 = dma.hbm_to_vmem [thread:$0]  %s547_s3, 512, %s45_s19, [#allocation6], %s431_s30, %s431_s30, %s432_s6  }
  0x33   :  { %423 = dma.done.wait [#allocation3], 256  }
  0x34   :  { %424 = vsyncadd [#allocation3], 4294967040 }
  0x35   :  { %425 = dma.done.wait [#allocation6], 1024  }
  0x36   :  { %426 = vsyncadd [#allocation6], 4294966272  ;;  %vm80_vm0 = vcmask 261120   ;;  %v62_v0 = vld [vmem:[#allocation5] sm:$0xff]  ;;  %v63_v1 = vld [vmem:[#allocation5 + $0x8] sm:$0xff]  ;;  %s434_s9 = smov [#allocation8]  }
  0x37   :  { %v64_v2 = vld [vmem:[#allocation5 + $0x10] sm:$0xff]  ;;  %v313_v3 = vpack.c.bf16 %v63_v1, %v62_v0  ;;  %v65_v4 = vld [vmem:[#allocation5 + $0x18] sm:$0xff]  ;;  %v66_v7 = vld [vmem:[#allocation7] sm:$0xff]  ;;  %s260_s10 = sshll.u32 %s434_s9, 4  ;;  %s261_s10 = int_to_ptr.vmem [resolvable:$true] %s260_s10 }
  0x38   :  { %v72_v5 = vld [vmem:[#allocation2] sm:$0xff]  ;;  %v317_v6 = vpack.c.bf16 %v65_v4, %v64_v2  ;;  %v67_v8 = vld [vmem:[#allocation7 + $0x8] sm:$0xff]  ;;  %v73_v10 = vld [vmem:[#allocation2 + $0x8] sm:$0xff]  ;;  %p406_p11 = scmp.lt.s32.totalorder %s261_s10, %s261_s10 }
  0x39   :  { %299 = vmatprep.mubr.msk.f32.mxu0 %vm80_vm0, %v72_v5  ;;  %314 = vmatprep.subr.bf16.mxu0 %v313_v3  ;;  %v321_v9 = vpack.c.bf16 %v67_v8, %v66_v7  ;;  %v68_v11 = vld [vmem:[#allocation7 + $0x10] sm:$0xff]  ;;  %v69_v12 = vld [vmem:[#allocation7 + $0x18] sm:$0xff] }
  0x3a   :  { %316 = vmatpush3.bf16.msra.mxu0 %v313_v3  ;;  %v325_v13 = vpack.c.bf16 %v69_v12, %v68_v11  ;;  %v273_v14 = vld [vmem:[%s546_s2] ss:$0 sm:$0xff]  ;;  %s401_s2 = scalar_lea.vmem %s261_s10, 256 }
  0x3b   :  { %318 = vmatprep.subr.bf16.mxu0 %v317_v6  ;;  %322 = vmatprep.subr.bf16.mxu1 %v321_v9  ;;  %v276_v21 = vld [vmem:[%s548_s4] ss:$0 sm:$0xff]  ;;  %p402_p10 = scmp.ne.s32.totalorder %s261_s10, %s401_s2  ;;  %p407_p12 = scmp.lt.s32.totalorder %s401_s2, %s401_s2 }
  0x3c   :  { %324 = vmatpush3.bf16.msra.mxu1 %v321_v9 }
  0x3d   :  { %326 = vmatprep.subr.bf16.mxu1 %v325_v13  ;;  %p408_p13 = por %p407_p12, %p406_p11 }
  0x3e   :  { %320 = vmatpush3.bf16.msra.mxu0 %v317_v6 }
  0x3f   :  { %p409_p0 = pnand %p408_p13, %p402_p10 }
  0x40   :  { %328 = vmatpush3.bf16.msra.mxu1 %v325_v13 }
  0x41   :  { %300 = vmatmul.mubr.msk.f32.vlgmr.msra.gmra.mrb[0].mxu0 %vm80_vm0, %v73_v10 }
 0x114   :  { %v301_v15 = vpop.f32.mrb[0].mxu0 }
 0x115   :  { %v159_v16 = vadd.f32 %v301_v15, %v273_v14  ;;  %v153_v17 = vpop.f32.mrb[1].mxu0 }
 0x116   :  { %v154_v18 = vadd.f32 %v273_v14, %v153_v17 }
 0x117   :  { %v163_v20 = vmax.f32 %v159_v16, 0.0 }
 0x118   :  { %v162_v19 = vmax.f32 %v154_v18, 0.0 }
 0x11a   :  { %310 = vmatprep.mubr.msk.f32.mxu1 %vm80_vm0, %v162_v19 }
 0x11b   :  { %311 = vmatmul.mubr.msk.f32.vlgmr.msra.gmra.mrb[0].mxu1 %vm80_vm0, %v163_v20 }
 0x1ee   :  { %v312_v22 = vpop.f32.mrb[0].mxu1 }
 0x1ef   :  { %v248_v23 = vadd.f32 %v312_v22, %v276_v21  ;;  %v242_v24 = vpop.f32.mrb[1].mxu1 }
 0x1f0   :  { %v243_v25 = vadd.f32 %v276_v21, %v242_v24 }
 0x1f1   :  { %v252_v26 = vadd.f32 %v248_v23, %v73_v10 }
 0x1f2   :  { %v251_v27 = vadd.f32 %v243_v25, %v72_v5 }
 0x1f3   :  { %254 = vst.msk [vmem:[#allocation8 + $0x8] sm:$0xff] %vm80_vm0, %v252_v26 }
 0x1f4   :  { %253 = vst.msk [vmem:[#allocation8] sm:$0xff] %vm80_vm0, %v251_v27 }
 0x1f5   :  { %412 = shalt.err (!%p409_p0)
}
 0x1f6   :  { %s413_s12 = scalar_lea.hbm %s549_s5, 256 }
 0x1f7   :  { %p414_p1 = scmp.ne.s32.totalorder %s549_s5, %s413_s12  ;;  %p417_p2 = scmp.lt.u32.totalorder %s413_s12, %s549_s5 }
 0x1f9   :  { %p419_p3 = pnand %p417_p2, %p414_p1 }
 0x1fb   :  { %422 = shalt.err (!%p419_p3)
}
 0x1fc   :  { %266 = dma.vmem_to_hbm [thread:$0]  %s261_s10, 256, %s549_s5, [#allocation4], %s431_s30, %s431_s30, %s432_s6  }
 0x1fd   :  { %427 = dma.done.wait [#allocation4], 256  }
 0x1fe   :  { %428 = vsyncadd [#allocation4], 4294967040 }
 0x1ff   :  { %270 = vsyncpa [#allocation3], 1 }
 0x200   :  { %271 = vsyncpa [#allocation6], 1 }
 0x201   :  { %272 = vsyncpa [#allocation4], 1 }

</bundles_post_ra>
